<compile_context>
chip_gen: v7x
topology: tpu7x:2x2x1
jax: 0.10.0
libtpu: 0.0.40
codegen_flags: <defaults>
</compile_context>

<pallas_src>
import jax
import jax.numpy as jnp
import numpy as np
from jax.experimental import pallas as pl
from jax.experimental.pallas import tpu as pltpu


# ---------------------------------------------------------------------------
# Placeholder Pallas kernel (identity copy) — only here so the harness has a
# real pallas_call to execute; it carries no MAGTitans semantics.
# ---------------------------------------------------------------------------
def _identity_kernel(x_ref, o_ref):
    o_ref[...] = x_ref[...]


def _sublane_multiple(dtype) -> int:
    """Sublane packing granularity: 8 for 4-byte, 16 for 2-byte, 32 for 1-byte."""
    itemsize = jnp.dtype(dtype).itemsize
    return max(8, 32 // max(itemsize, 1))


def _largest_aligned_divisor(n: int, cap: int, align: int):
    """Largest d with d | n, d <= cap, d % align == 0.  None if no such d."""
    best = None
    d = align
    limit = min(cap, n)
    while d <= limit:
        if n % d == 0:
            best = d
        d += align
    return best


def _block_spec(shape, index_map, buffer_count=None):
    """BlockSpec with optional multi-buffering; falls back gracefully."""
    if buffer_count is None:
        return pl.BlockSpec(shape, index_map)
    try:
        return pl.BlockSpec(shape, index_map, pipeline_mode=pl.Buffered(buffer_count))
    except TypeError:
        return pl.BlockSpec(shape, index_map)


def run_placeholder_kernel(
    x: jax.Array,
    *,
    skip_identity: bool = True,
    single_block_bytes: int = 256 << 10,   # <= 256 KiB -> one full-array block
    target_block_bytes: int = 2 << 20,     # ~2 MiB per tile on the tiled path
) -> jax.Array:
    """Identity copy, tuned for HBM-bandwidth efficiency on v5e/v6e/v7x.

    Because the op is a semantic no-op, the default (skip_identity=True)
    returns `x` directly: no pallas_call, no HBM round-trip.  Set
    skip_identity=False to actually run the Pallas copy pipeline.

    Tile selection on the kernel path:
      * whole array <= single_block_bytes  -> one full-array block, grid (1,1)
        (block_shape == array shape is always legal; zero per-step overhead).
      * otherwise -> full-width (contiguous) tiles: tile_c = cols, tile_r is
        the largest sublane-aligned divisor of rows that (a) keeps the tile
        near target_block_bytes and (b) gives >= 2 grid steps along rows so
        both TensorCores of a v7x chip can stream halves concurrently.
    """
    if skip_identity:
        # Pure identity: the only way to get "zero HBM traffic" is to not run
        # the copy.  input_output_aliases would NOT remove the 2x traffic.
        return x

    rows, cols = x.shape
    itemsize = jnp.dtype(x.dtype).itemsize
    sub = _sublane_multiple(x.dtype)
    total_bytes = rows * cols * itemsize

    buffer_count = None
    if total_bytes <= single_block_bytes:
        # Single full-array block: removes all per-step grid overhead for
        # tiny inputs (the 16x128 demo is only 8 KiB).
        tile_r, tile_c = rows, cols
    else:
        row_bytes = cols * itemsize
        if row_bytes * sub > target_block_bytes and cols > 128:
            # Pathological: even a minimum-height full-width block blows the
            # per-tile budget -> split the lane axis (rare; not hit in demo).
            tile_c = max(128, min(cols, (target_block_bytes // (sub * itemsize)) // 128 * 128))
            tile_r = min(rows, sub) if rows >= sub else rows
        else:
            # Preferred: full-width contiguous tiles (single HBM stream per
            # row block, guaranteed lane-dense unmasked stores).
            tile_c = cols
            max_rows_by_bytes = max(sub, (target_block_bytes // max(row_bytes, 1)) // sub * sub)
            if rows >= 2 * sub:
                # Guarantee >= 2 grid steps along rows (v7x has 2 TCs/chip).
                half_rows = max(sub, (rows // 2) // sub * sub)
                row_cap = min(max_rows_by_bytes, half_rows)
            else:
                row_cap = rows
            if rows % sub == 0 and rows >= sub:
                # Divisor-aligned rows: no ragged tail, no masked edge stores.
                tile_r = _largest_aligned_divisor(rows, row_cap, sub) or min(row_cap, rows)
            else:
                tile_r = min(row_cap, rows)
        # Pure copy has no compute to hide DMA latency; a third buffer keeps
        # more DMAs in flight across the read/write turnaround.
        buffer_count = 3

    grid = (pl.cdiv(rows, tile_r), pl.cdiv(cols, tile_c))
    if grid[0] * grid[1] <= 1:
        buffer_count = None  # no pipelining to deepen on a 1-step grid

    return pl.pallas_call(
        _identity_kernel,
        out_shape=jax.ShapeDtypeStruct((rows, cols), x.dtype),
        grid_spec=pltpu.PrefetchScalarGridSpec(
            num_scalar_prefetch=0,
            grid=grid,
            in_specs=[_block_spec((tile_r, tile_c), lambda i, j: (i, j), buffer_count)],
            out_specs=_block_spec((tile_r, tile_c), lambda i, j: (i, j), buffer_count),
        ),
        # Purely memory-bound custom call: tell XLA so it can overlap
        # neighboring ops with it.
        cost_estimate=pl.CostEstimate(
            flops=0, transcendentals=0, bytes_accessed=2 * total_bytes),
        compiler_params=pltpu.CompilerParams(
            # Near-zero effect on 1-TC chips (v5e/v6e); lets v7x's two
            # TensorCores shard multi-step grids.
            dimension_semantics=("parallel", "parallel"),
        ),
    )(x)


# ---------------------------------------------------------------------------
# MAGTitans equivalent
# ---------------------------------------------------------------------------
class MAGTitansJAX:
    """JAX equivalent of the MAGTitans interface module.

    __init__ registers nothing; forward() returns None (matches reference).
    """

    def __init__(self, cfg=None):
        del cfg  # reference module ignores cfg too
        # No parameters to initialize: the PyTorch __init__ creates none.

    def forward(self):
        # Exactly mirrors `def forward(self): return` -> None.
        return None

    __call__ = forward


if __name__ == "__main__":
    key = jax.random.PRNGKey(0)
    k_small, k_big = jax.random.split(key)

    # --- Small input.
    x_small = jax.random.normal(k_small, (16, 128), dtype=jnp.float32)
    x_small_host = np.asarray(x_small)

    # Default path: identity is short-circuited, no pallas_call at all.
    y_shortcut = run_placeholder_kernel(x_small)
    assert y_shortcut is x_small

    # Forced kernel path: single full-array block, grid (1, 1).
    y_small = run_placeholder_kernel(x_small, skip_identity=False)
    jax.block_until_ready(y_small)
    assert y_small.shape == x_small_host.shape
    assert np.allclose(np.asarray(y_small), x_small_host)

    # --- Larger input: exercises the tiled path with full-width 512x512
    #     (1 MiB) blocks, grid (2, 1), triple-buffered DMA.
    x_big = jax.random.normal(k_big, (1024, 512), dtype=jnp.float32)
    x_big_host = np.asarray(x_big)
    y_big = run_placeholder_kernel(x_big, skip_identity=False)
    jax.block_until_ready(y_big)
    assert y_big.shape == x_big_host.shape
    assert np.allclose(np.asarray(y_big), x_big_host)

    # Run the module-equivalent forward: must return None, like PyTorch.
    model = MAGTitansJAX(cfg=None)
    out = model()
    assert out is None

    print("KERNEL_OK")
</pallas_src>

<mosaic_0001>
module attributes {stable_mosaic.version = 11 : i64} {
  func.func @_identity_kernel(%arg0: i32, %arg1: i32, %arg2: memref<16x128xf32, #tpu.memory_space<vmem>>, %arg3: memref<16x128xf32, #tpu.memory_space<vmem>>) attributes {dimension_semantics = [#tpu.dimension_semantics<parallel>, #tpu.dimension_semantics<parallel>], iteration_bounds = array<i64: 1, 1>, scalar_prefetch = 0 : i64, scratch_operands = 0 : i64, tpu.core_type = #tpu.core_type<tc>, window_params = [{transform_indices = @transform_0, window_bounds = array<i64: 16, 128>}, {transform_indices = @transform_1, window_bounds = array<i64: 16, 128>}]} {
    %c0 = arith.constant 0 : index
    %c0_0 = arith.constant 0 : index
    %0 = vector.load %arg2[%c0, %c0_0] : memref<16x128xf32, #tpu.memory_space<vmem>>, vector<16x128xf32>
    %c0_1 = arith.constant 0 : index
    %c0_2 = arith.constant 0 : index
    %1 = vector.load %arg3[%c0_1, %c0_2] : memref<16x128xf32, #tpu.memory_space<vmem>>, vector<16x128xf32>
    tpu.vector_store %arg3[%c0_1, %c0_2], %0 {strides = array<i32>} : memref<16x128xf32, #tpu.memory_space<vmem>>, vector<16x128xf32>,
    return
  }
  func.func @transform_0(%arg0: i32, %arg1: i32) -> (i32, i32) {
    %c0_i32 = arith.constant 0 : i32
    return %arg0, %arg1 : i32, i32
  }
  func.func @transform_1(%arg0: i32, %arg1: i32) -> (i32, i32) {
    %c0_i32 = arith.constant 0 : i32
    return %arg0, %arg1 : i32, i32
  }
}

</mosaic_0001>

<bundles_post_ra>
// kernel: tpu_custom_call.1
= control target key start
LH: loop header
LB: loop body
LE: loop exit
PB: predicated region body
PF: predicated region fallthrough
CT: control target
= control target key end

     0   :  { %6 = vsyncpa [#allocation3], 0  ;;  %s134_s0 = inlined_call_operand.hbm [shape: f32[16,128], index: 0, kind: input, shape index: {}]   ;;  %s135_s1 = inlined_call_operand.hbm [shape: f32[16,128], index: 1, kind: output, shape index: {}]  }
   0x1   :  { %7 = vsyncpa [#allocation4], 0  ;;  %s96_s6 = smov [#allocation2]   ;;  %s48_s10 = scalar_lea.hbm %s134_s0, 256 }
   0x2   :  { %s13_s7 = sshll.u32 %s96_s6, 4  ;;  %p49_p0 = scmp.ne.s32.totalorder %s134_s0, %s48_s10  ;;  %s14_s7 = int_to_ptr.vmem [resolvable:$true] %s13_s7 }
   0x3   :  { %p52_p1 = scmp.lt.u32.totalorder %s48_s10, %s134_s0 }
   0x5   :  { %p54_p2 = pnand %p52_p1, %p49_p0 }
   0x7   :  { %57 = shalt.err (!%p54_p2)
}
   0x8   :  { %s58_s15 = scalar_lea.vmem %s14_s7, 256  ;;  %p63_p4 = scmp.lt.s32.totalorder %s14_s7, %s14_s7 }
   0x9   :  { %p59_p3 = scmp.ne.s32.totalorder %s14_s7, %s58_s15  ;;  %p64_p5 = scmp.lt.s32.totalorder %s58_s15, %s58_s15 }
   0xb   :  { %p65_p6 = por %p64_p5, %p63_p4 }
   0xd   :  { %p66_p7 = pnand %p65_p6, %p59_p3 }
   0xf   :  { %69 = shalt.err (!%p66_p7)
}
  0x10   :  { %s97_s16 = smov 128   ;;  %s98_s17 = smov 8  }
  0x11   :  { %19 = dma.hbm_to_vmem [thread:$0]  %s134_s0, 256, %s14_s7, [#allocation3], %s97_s16, %s97_s16, %s98_s17  }
  0x12   :  { %92 = dma.done.wait [#allocation3], 256  }
  0x13   :  { %93 = vsyncadd [#allocation3], 4294967040  ;;  %s99_s20 = smov [#allocation5]   ;;  %v23_v0 = vld [vmem:[#allocation2] sm:$0xff]  ;;  %v24_v1 = vld [vmem:[#allocation2 + $0x8] sm:$0xff] }
  0x14   :  { %s32_s21 = sshll.u32 %s99_s20, 4  ;;  %25 = vst [vmem:[#allocation5] sm:$0xff] %v23_v0  ;;  %26 = vst [vmem:[#allocation5 + $0x8] sm:$0xff] %v24_v1  ;;  %s33_s21 = int_to_ptr.vmem [resolvable:$true] %s32_s21 }
  0x15   :  { %s70_s22 = scalar_lea.vmem %s33_s21, 256  ;;  %p75_p9 = scmp.lt.s32.totalorder %s33_s21, %s33_s21 }
  0x16   :  { %p71_p8 = scmp.ne.s32.totalorder %s33_s21, %s70_s22  ;;  %p76_p10 = scmp.lt.s32.totalorder %s70_s22, %s70_s22 }
  0x18   :  { %p77_p11 = por %p76_p10, %p75_p9 }
  0x1a   :  { %p78_p12 = pnand %p77_p11, %p71_p8 }
  0x1c   :  { %81 = shalt.err (!%p78_p12)
}
  0x1d   :  { %s82_s0 = scalar_lea.hbm %s135_s1, 256 }
  0x1e   :  { %p83_p13 = scmp.ne.s32.totalorder %s135_s1, %s82_s0  ;;  %p86_p0 = scmp.lt.u32.totalorder %s82_s0, %s135_s1 }
  0x20   :  { %p88_p1 = pnand %p86_p0, %p83_p13 }
  0x22   :  { %91 = shalt.err (!%p88_p1)
}
  0x23   :  { %38 = dma.vmem_to_hbm [thread:$0]  %s33_s21, 256, %s135_s1, [#allocation4], %s97_s16, %s97_s16, %s98_s17  }
  0x24   :  { %94 = dma.done.wait [#allocation4], 256  }
  0x25   :  { %95 = vsyncadd [#allocation4], 4294967040 }
  0x26   :  { %42 = vsyncpa [#allocation3], 1 }
  0x27   :  { %43 = vsyncpa [#allocation4], 1 }

</bundles_post_ra>
